<compile_context>
chip_gen: v7x
topology: tpu7x:2x2x1
jax: 0.10.0
libtpu: 0.0.40
codegen_flags: <defaults>
</compile_context>

<pallas_src>
import functools
import math

import jax
import jax.numpy as jnp
from jax.experimental import pallas as pl
from jax.experimental.pallas import tpu as pltpu


def _round_up(x, m):
    return ((x + m - 1) // m) * m


def _pad_rows(x2d, rows):
    m = x2d.shape[0]
    if rows == m:
        return x2d
    return jnp.pad(x2d, ((0, rows - m), (0, 0)))


# ---------------------------------------------------------------------------
# Kernels
# ---------------------------------------------------------------------------
def _linear_kernel(x_ref, w_ref, b_ref, o_ref):
    # x: (tm, d_in), w: (d_in, d_out), b: (1, d_out)
    y = jnp.dot(x_ref[...], w_ref[...], preferred_element_type=jnp.float32)
    o_ref[...] = (y + b_ref[...].astype(jnp.float32)).astype(o_ref.dtype)


def _ffn_kernel(x_ref, w1_ref, b1_ref, w2_ref, b2_ref, o_ref):
    # relu(x @ W1 + b1) @ W2 + b2, f32 accumulation, operands kept in input dtype.
    x = x_ref[...]
    h = jnp.dot(x, w1_ref[...], preferred_element_type=jnp.float32)
    h = jnp.maximum(h + b1_ref[...].astype(jnp.float32), 0.0).astype(x.dtype)
    y = jnp.dot(h, w2_ref[...], preferred_element_type=jnp.float32)
    o_ref[...] = (y + b2_ref[...].astype(jnp.float32)).astype(o_ref.dtype)


def _ln_mask_kernel(x_ref, g_ref, b_ref, m_ref, o_ref, *, eps):
    # LayerNorm over last dim, then multiply by non_pad_mask (tm, 1).
    x = x_ref[...].astype(jnp.float32)
    mu = jnp.mean(x, axis=-1, keepdims=True)
    xc = x - mu
    var = jnp.mean(xc * xc, axis=-1, keepdims=True)
    y = xc * jax.lax.rsqrt(var + eps)
    y = y * g_ref[...].astype(jnp.float32) + b_ref[...].astype(jnp.float32)
    o_ref[...] = (y * m_ref[...].astype(jnp.float32)).astype(o_ref.dtype)


def _attn_kernel(q_ref, k_ref, v_ref, m_ref, o_ref, *, scale):
    # One (head*batch) slice per grid step: q (1,Lq,dk), k (1,Lk,dk), v (1,Lk,dv),
    # mask (1,Lq,Lk) with nonzero == masked.
    s = jnp.einsum("bqd,bkd->bqk", q_ref[...], k_ref[...],
                   preferred_element_type=jnp.float32) * scale
    s = jnp.where(m_ref[...] > 0, jnp.float32(-1e30), s)
    m = jnp.max(s, axis=-1, keepdims=True)
    e = jnp.exp(s - m)
    p = e / jnp.sum(e, axis=-1, keepdims=True)
    o = jnp.einsum("bqk,bkd->bqd", p.astype(v_ref.dtype), v_ref[...],
                   preferred_element_type=jnp.float32)
    o_ref[...] = o.astype(o_ref.dtype)


# ---------------------------------------------------------------------------
# Pallas wrappers
# ---------------------------------------------------------------------------
def _pallas_linear(x2d, w, b, *, tm=256):
    M, d_in = x2d.shape
    d_out = w.shape[1]
    tm = min(tm, _round_up(M, 8))
    mp = _round_up(M, tm)
    xp = _pad_rows(x2d, mp)
    out = pl.pallas_call(
        _linear_kernel,
        out_shape=jax.ShapeDtypeStruct((mp, d_out), x2d.dtype),
        grid_spec=pltpu.PrefetchScalarGridSpec(
            num_scalar_prefetch=0,
            grid=(mp // tm,),
            in_specs=[
                pl.BlockSpec((tm, d_in), lambda i: (i, 0)),
                pl.BlockSpec((d_in, d_out), lambda i: (0, 0)),
                pl.BlockSpec((1, d_out), lambda i: (0, 0)),
            ],
            out_specs=pl.BlockSpec((tm, d_out), lambda i: (i, 0)),
        ),
        compiler_params=pltpu.CompilerParams(dimension_semantics=("parallel",)),
    )(xp, w, b.reshape(1, d_out))
    return out[:M]


def _pallas_ffn(x2d, w1, b1, w2, b2, *, tm=256):
    M, d_in = x2d.shape
    d_hid = w1.shape[1]
    tm = min(tm, _round_up(M, 8))
    mp = _round_up(M, tm)
    xp = _pad_rows(x2d, mp)
    out = pl.pallas_call(
        _ffn_kernel,
        out_shape=jax.ShapeDtypeStruct((mp, d_in), x2d.dtype),
        grid_spec=pltpu.PrefetchScalarGridSpec(
            num_scalar_prefetch=0,
            grid=(mp // tm,),
            in_specs=[
                pl.BlockSpec((tm, d_in), lambda i: (i, 0)),
                pl.BlockSpec((d_in, d_hid), lambda i: (0, 0)),
                pl.BlockSpec((1, d_hid), lambda i: (0, 0)),
                pl.BlockSpec((d_hid, d_in), lambda i: (0, 0)),
                pl.BlockSpec((1, d_in), lambda i: (0, 0)),
            ],
            out_specs=pl.BlockSpec((tm, d_in), lambda i: (i, 0)),
        ),
        compiler_params=pltpu.CompilerParams(dimension_semantics=("parallel",)),
    )(xp, w1, b1.reshape(1, d_hid), w2, b2.reshape(1, d_in))
    return out[:M]


def _pallas_ln_mask(x2d, gamma, beta, mask2d, *, eps=1e-5, tm=256):
    M, d = x2d.shape
    tm = min(tm, _round_up(M, 8))
    mp = _round_up(M, tm)
    xp = _pad_rows(x2d, mp)
    mpad = _pad_rows(mask2d, mp)
    out = pl.pallas_call(
        functools.partial(_ln_mask_kernel, eps=eps),
        out_shape=jax.ShapeDtypeStruct((mp, d), x2d.dtype),
        grid_spec=pltpu.PrefetchScalarGridSpec(
            num_scalar_prefetch=0,
            grid=(mp // tm,),
            in_specs=[
                pl.BlockSpec((tm, d), lambda i: (i, 0)),
                pl.BlockSpec((1, d), lambda i: (0, 0)),
                pl.BlockSpec((1, d), lambda i: (0, 0)),
                pl.BlockSpec((tm, 1), lambda i: (i, 0)),
            ],
            out_specs=pl.BlockSpec((tm, d), lambda i: (i, 0)),
        ),
        compiler_params=pltpu.CompilerParams(dimension_semantics=("parallel",)),
    )(xp, gamma.reshape(1, d), beta.reshape(1, d), mpad)
    return out[:M]


def _pallas_attention(q, k, v, mask, *, scale):
    G, Lq, d_k = q.shape
    Lk, d_v = k.shape[1], v.shape[2]
    return pl.pallas_call(
        functools.partial(_attn_kernel, scale=scale),
        out_shape=jax.ShapeDtypeStruct((G, Lq, d_v), q.dtype),
        grid_spec=pltpu.PrefetchScalarGridSpec(
            num_scalar_prefetch=0,
            grid=(G,),
            in_specs=[
                pl.BlockSpec((1, Lq, d_k), lambda g: (g, 0, 0)),
                pl.BlockSpec((1, Lk, d_k), lambda g: (g, 0, 0)),
                pl.BlockSpec((1, Lk, d_v), lambda g: (g, 0, 0)),
                pl.BlockSpec((1, Lq, Lk), lambda g: (g, 0, 0)),
            ],
            out_specs=pl.BlockSpec((1, Lq, d_v), lambda g: (g, 0, 0)),
        ),
        compiler_params=pltpu.CompilerParams(dimension_semantics=("parallel",)),
    )(q, k, v, mask)


# ---------------------------------------------------------------------------
# Module-level forward
# ---------------------------------------------------------------------------
def _multi_head_attention(q_in, k_in, v_in, mask, p, *, n_head, d_k, d_v, tm):
    B, Lq, d_model = q_in.shape
    Lk = k_in.shape[1]
    q = _pallas_linear(q_in.reshape(B * Lq, d_model), p["wq"], p["bq"], tm=tm)
    k = _pallas_linear(k_in.reshape(B * Lk, d_model), p["wk"], p["bk"], tm=tm)
    v = _pallas_linear(v_in.reshape(B * Lk, d_model), p["wv"], p["bv"], tm=tm)
    # (B, L, H, d) -> (H*B, L, d), matching the PyTorch permute(2,0,1,3).view(-1, L, d)
    q = jnp.transpose(q.reshape(B, Lq, n_head, d_k), (2, 0, 1, 3)).reshape(n_head * B, Lq, d_k)
    k = jnp.transpose(k.reshape(B, Lk, n_head, d_k), (2, 0, 1, 3)).reshape(n_head * B, Lk, d_k)
    v = jnp.transpose(v.reshape(B, Lk, n_head, d_v), (2, 0, 1, 3)).reshape(n_head * B, Lk, d_v)
    mask_r = jnp.tile(mask.astype(jnp.float32), (n_head, 1, 1))      # mask.repeat(n_head,1,1)
    o = _pallas_attention(q, k, v, mask_r, scale=1.0 / math.sqrt(d_k))
    o = jnp.transpose(o.reshape(n_head, B, Lq, d_v), (1, 2, 0, 3)).reshape(B, Lq, n_head * d_v)
    out = _pallas_linear(o.reshape(B * Lq, n_head * d_v), p["wo"], p["bo"], tm=tm)
    return out.reshape(B, Lq, d_model)


@functools.partial(jax.jit, static_argnames=("n_head", "d_k", "d_v", "add_time", "tm"))
def node_decoder_layer(t, dec_input, enc_output, non_pad_mask,
                       slf_attn_mask, dec_enc_attn_mask, params,
                       *, n_head, d_k, d_v, add_time=True, tm=256):
    B, L, d_model = dec_input.shape
    gamma, beta = params["ln"]["gamma"], params["ln"]["beta"]
    npm2d = jnp.broadcast_to(non_pad_mask, (B, L, 1)).reshape(B * L, 1).astype(dec_input.dtype)

    def ln_mask(x):
        y = _pallas_ln_mask(x.reshape(B * L, d_model), gamma, beta, npm2d, tm=tm)
        return y.reshape(B, L, d_model)

    x = dec_input + t if add_time else dec_input

    y = _multi_head_attention(x, x, x, slf_attn_mask, params["slf"],
                              n_head=n_head, d_k=d_k, d_v=d_v, tm=tm)
    y = ln_mask(y)
    y = _multi_head_attention(y, enc_output, enc_output, dec_enc_attn_mask, params["enc"],
                              n_head=n_head, d_k=d_k, d_v=d_v, tm=tm)
    y = ln_mask(y)
    f = params["ffn"]
    y = _pallas_ffn(y.reshape(B * L, d_model), f["w1"], f["b1"], f["w2"], f["b2"], tm=tm)
    y = ln_mask(y.reshape(B, L, d_model))
    return y


# ---------------------------------------------------------------------------
# Pure-JAX reference (same math) for the correctness check
# ---------------------------------------------------------------------------
def _ref_layer_norm(x, g, b, eps=1e-5):
    mu = x.mean(axis=-1, keepdims=True)
    var = ((x - mu) ** 2).mean(axis=-1, keepdims=True)
    return (x - mu) / jnp.sqrt(var + eps) * g + b


def _ref_mha(q_in, k_in, v_in, mask, p, n_head, d_k, d_v):
    B, Lq, _ = q_in.shape
    Lk = k_in.shape[1]
    q = q_in @ p["wq"] + p["bq"]
    k = k_in @ p["wk"] + p["bk"]
    v = v_in @ p["wv"] + p["bv"]
    q = jnp.transpose(q.reshape(B, Lq, n_head, d_k), (2, 0, 1, 3)).reshape(n_head * B, Lq, d_k)
    k = jnp.transpose(k.reshape(B, Lk, n_head, d_k), (2, 0, 1, 3)).reshape(n_head * B, Lk, d_k)
    v = jnp.transpose(v.reshape(B, Lk, n_head, d_v), (2, 0, 1, 3)).reshape(n_head * B, Lk, d_v)
    s = jnp.einsum("gqd,gkd->gqk", q, k) / math.sqrt(d_k)
    mask_r = jnp.tile(mask.astype(jnp.float32), (n_head, 1, 1))
    s = jnp.where(mask_r > 0, -1e30, s)
    a = jax.nn.softmax(s, axis=-1)
    o = jnp.einsum("gqk,gkd->gqd", a, v)
    o = jnp.transpose(o.reshape(n_head, B, Lq, d_v), (1, 2, 0, 3)).reshape(B, Lq, n_head * d_v)
    return o @ p["wo"] + p["bo"]


def _ref_decoder_layer(t, dec_input, enc_output, non_pad_mask, slf_mask, dec_enc_mask,
                       params, n_head, d_k, d_v, add_time=True):
    gamma, beta = params["ln"]["gamma"], params["ln"]["beta"]
    x = dec_input + t if add_time else dec_input
    y = _ref_mha(x, x, x, slf_mask, params["slf"], n_head, d_k, d_v)
    y = _ref_layer_norm(y, gamma, beta) * non_pad_mask
    y = _ref_mha(y, enc_output, enc_output, dec_enc_mask, params["enc"], n_head, d_k, d_v)
    y = _ref_layer_norm(y, gamma, beta) * non_pad_mask
    f = params["ffn"]
    y = jnp.maximum(y @ f["w1"] + f["b1"], 0.0) @ f["w2"] + f["b2"]
    y = _ref_layer_norm(y, gamma, beta) * non_pad_mask
    return y


if __name__ == "__main__":
    key = jax.random.PRNGKey(0)
    ks = list(jax.random.split(key, 12))

    B, L_dec, L_enc = 2, 8, 12
    d_model, d_inner, n_head, d_k, d_v = 32, 64, 4, 8, 8

    def nrm(k, shape, std=0.1):
        return jax.random.normal(k, shape, dtype=jnp.float32) * std

    def attn_params(k0):
        kk = jax.random.split(k0, 8)
        return {
            "wq": nrm(kk[0], (d_model, n_head * d_k)),   # matmul-ready (in, out) layout
            "bq": nrm(kk[1], (n_head * d_k,)),
            "wk": nrm(kk[2], (d_model, n_head * d_k)),
            "bk": nrm(kk[3], (n_head * d_k,)),
            "wv": nrm(kk[4], (d_model, n_head * d_v)),
            "bv": nrm(kk[5], (n_head * d_v,)),
            "wo": nrm(kk[6], (n_head * d_v, d_model)),
            "bo": nrm(kk[7], (d_model,)),
        }

    params = {
        "slf": attn_params(ks[0]),
        "enc": attn_params(ks[1]),
        "ffn": {
            "w1": nrm(ks[2], (d_model, d_inner)),        # Conv1d(d_model,d_inner,1) as (in,out)
            "b1": nrm(ks[3], (d_inner,)),
            "w2": nrm(ks[4], (d_inner, d_model)),
            "b2": nrm(ks[5], (d_model,)),
        },
        "ln": {
            "gamma": 1.0 + nrm(ks[6], (d_model,)),
            "beta": nrm(ks[7], (d_model,)),
        },
    }

    t = jnp.float32(0.1)
    dec_input = jax.random.normal(ks[8], (B, L_dec, d_model), dtype=jnp.float32)
    enc_output = jax.random.normal(ks[9], (B, L_enc, d_model), dtype=jnp.float32)

    # Padding masks: nonzero == masked key position; non_pad_mask is 1.0 on valid rows.
    dec_lens = jnp.array([L_dec, L_dec - 2])
    enc_lens = jnp.array([L_enc, L_enc - 3])
    pos_d = jnp.arange(L_dec)
    pos_e = jnp.arange(L_enc)
    non_pad_mask = (pos_d[None, :] < dec_lens[:, None]).astype(jnp.float32)[:, :, None]
    slf_attn_mask = jnp.broadcast_to(
        (pos_d[None, None, :] >= dec_lens[:, None, None]).astype(jnp.float32),
        (B, L_dec, L_dec))
    dec_enc_attn_mask = jnp.broadcast_to(
        (pos_e[None, None, :] >= enc_lens[:, None, None]).astype(jnp.float32),
        (B, L_dec, L_enc))

    out = node_decoder_layer(t, dec_input, enc_output, non_pad_mask,
                             slf_attn_mask, dec_enc_attn_mask, params,
                             n_head=n_head, d_k=d_k, d_v=d_v, add_time=True)
    out = jax.block_until_ready(out)

    ref = _ref_decoder_layer(t, dec_input, enc_output, non_pad_mask,
                             slf_attn_mask, dec_enc_attn_mask, params,
                             n_head, d_k, d_v, add_time=True)

    assert out.shape == (B, L_dec, d_model)
    assert bool(jnp.allclose(out, ref, atol=1e-4, rtol=1e-4)), \
        float(jnp.max(jnp.abs(out - ref)))

    print("KERNEL_OK")
</pallas_src>

<mosaic_0001>
module attributes {stable_mosaic.version = 11 : i64} {
  func.func @_linear_kernel(%arg0: i32, %arg1: memref<16x32xf32, #tpu.memory_space<vmem>>, %arg2: memref<32x32xf32, #tpu.memory_space<vmem>>, %arg3: memref<1x32xf32, #tpu.memory_space<vmem>>, %arg4: memref<16x32xf32, #tpu.memory_space<vmem>>) attributes {dimension_semantics = [#tpu.dimension_semantics<parallel>], iteration_bounds = array<i64: 1>, scalar_prefetch = 0 : i64, scratch_operands = 0 : i64, tpu.core_type = #tpu.core_type<tc>, window_params = [{transform_indices = @transform_0, window_bounds = array<i64: 16, 32>}, {pipeline_mode = #tpu.pipeline_mode<synchronous>, transform_indices = @transform_1, window_bounds = array<i64: 32, 32>}, {pipeline_mode = #tpu.pipeline_mode<synchronous>, transform_indices = @transform_2, window_bounds = array<i64: 1, 32>}, {transform_indices = @transform_3, window_bounds = array<i64: 16, 32>}]} {
    %c0 = arith.constant 0 : index
    %c0_0 = arith.constant 0 : index
    %0 = vector.load %arg1[%c0, %c0_0] : memref<16x32xf32, #tpu.memory_space<vmem>>, vector<16x32xf32>
    %c0_1 = arith.constant 0 : index
    %c0_2 = arith.constant 0 : index
    %1 = vector.load %arg2[%c0_1, %c0_2] : memref<32x32xf32, #tpu.memory_space<vmem>>, vector<32x32xf32>
    %cst = arith.constant dense<0.000000e+00> : vector<16x32xf32>
    %2 = tpu.matmul %0, %1, %cst {dimension_numbers = #tpu.dot_dimension_numbers<[1], [0], [0], [1], [0, 0, 1, 1], [], []>} : vector<16x32xf32>, vector<32x32xf32>, vector<16x32xf32> -> vector<16x32xf32>
    %c0_3 = arith.constant 0 : index
    %c0_4 = arith.constant 0 : index
    %3 = vector.load %arg3[%c0_3, %c0_4] : memref<1x32xf32, #tpu.memory_space<vmem>>, vector<1x32xf32>
    %4 = vector.broadcast %3 : vector<1x32xf32> to vector<16x32xf32>
    %5 = arith.addf %2, %4 : vector<16x32xf32>
    %c0_5 = arith.constant 0 : index
    %c0_6 = arith.constant 0 : index
    %6 = vector.load %arg4[%c0_5, %c0_6] : memref<16x32xf32, #tpu.memory_space<vmem>>, vector<16x32xf32>
    tpu.vector_store %arg4[%c0_5, %c0_6], %5 {strides = array<i32>} : memref<16x32xf32, #tpu.memory_space<vmem>>, vector<16x32xf32>,
    return
  }
  func.func @transform_0(%arg0: i32) -> (i32, i32) {
    %c0_i32 = arith.constant 0 : i32
    %c0_i32_0 = arith.constant 0 : i32
    return %arg0, %c0_i32 : i32, i32
  }
  func.func @transform_1(%arg0: i32) -> (i32, i32) {
    %c0_i32 = arith.constant 0 : i32
    %c0_i32_0 = arith.constant 0 : i32
    %c0_i32_1 = arith.constant 0 : i32
    return %c0_i32, %c0_i32_0 : i32, i32
  }
  func.func @transform_2(%arg0: i32) -> (i32, i32) {
    %c0_i32 = arith.constant 0 : i32
    %c0_i32_0 = arith.constant 0 : i32
    %c0_i32_1 = arith.constant 0 : i32
    return %c0_i32, %c0_i32_0 : i32, i32
  }
  func.func @transform_3(%arg0: i32) -> (i32, i32) {
    %c0_i32 = arith.constant 0 : i32
    %c0_i32_0 = arith.constant 0 : i32
    return %arg0, %c0_i32 : i32, i32
  }
}

module attributes {stable_mosaic.version = 11 : i64} {
  func.func @_attn_kernel(%arg0: i32, %arg1: memref<1x8x8xf32, #tpu.memory_space<vmem>>, %arg2: memref<1x8x8xf32, #tpu.memory_space<vmem>>, %arg3: memref<1x8x8xf32, #tpu.memory_space<vmem>>, %arg4: memref<1x8x8xf32, #tpu.memory_space<vmem>>, %arg5: memref<1x8x8xf32, #tpu.memory_space<vmem>>) attributes {dimension_semantics = [#tpu.dimension_semantics<parallel>], iteration_bounds = array<i64: 8>, scalar_prefetch = 0 : i64, scratch_operands = 0 : i64, tpu.core_type = #tpu.core_type<tc>, window_params = [{transform_indices = @transform_0, window_bounds = array<i64: 1, 8, 8>}, {transform_indices = @transform_1, window_bounds = array<i64: 1, 8, 8>}, {transform_indices = @transform_2, window_bounds = array<i64: 1, 8, 8>}, {transform_indices = @transform_3, window_bounds = array<i64: 1, 8, 8>}, {transform_indices = @transform_4, window_bounds = array<i64: 1, 8, 8>}]} {
    %c0 = arith.constant 0 : index
    %c0_0 = arith.constant 0 : index
    %c0_1 = arith.constant 0 : index
    %0 = vector.load %arg1[%c0, %c0_0, %c0_1] : memref<1x8x8xf32, #tpu.memory_space<vmem>>, vector<1x8x8xf32>
    %c0_2 = arith.constant 0 : index
    %c0_3 = arith.constant 0 : index
    %c0_4 = arith.constant 0 : index
    %1 = vector.load %arg2[%c0_2, %c0_3, %c0_4] : memref<1x8x8xf32, #tpu.memory_space<vmem>>, vector<1x8x8xf32>
    "tpu.trace_start"() <{level = 10 : i32, message = "bqd,bkd->bqk"}> : () -> ()
    %cst = arith.constant dense<0.000000e+00> : vector<1x8x8xf32>
    %2 = tpu.matmul %0, %1, %cst {dimension_numbers = #tpu.dot_dimension_numbers<[2], [2], [1], [1], [0, 0, 0, 1, 1, 1], [0], [0]>} : vector<1x8x8xf32>, vector<1x8x8xf32>, vector<1x8x8xf32> -> vector<1x8x8xf32>
    "tpu.trace_stop"() : () -> ()
    %cst_5 = arith.constant 0.353553385 : f32
    %3 = vector.broadcast %cst_5 : f32 to vector<1x8x8xf32>
    %4 = arith.mulf %2, %3 : vector<1x8x8xf32>
    %c0_6 = arith.constant 0 : index
    %c0_7 = arith.constant 0 : index
    %c0_8 = arith.constant 0 : index
    %5 = vector.load %arg4[%c0_6, %c0_7, %c0_8] : memref<1x8x8xf32, #tpu.memory_space<vmem>>, vector<1x8x8xf32>
    %cst_9 = arith.constant 0.000000e+00 : f32
    %6 = vector.broadcast %cst_9 : f32 to vector<1x8x8xf32>
    %7 = arith.cmpf ogt, %5, %6 : vector<1x8x8xf32>
    %cst_10 = arith.constant -1.000000e+30 : f32
    %8 = vector.broadcast %cst_10 : f32 to vector<1x8x8xf32>
    %9 = arith.select %7, %8, %4 : vector<1x8x8xi1>, vector<1x8x8xf32>
    %cst_11 = arith.constant dense<0xFF800000> : vector<1x8xf32>
    %10 = vector.multi_reduction <maximumf>, %9, %cst_11 [2] : vector<1x8x8xf32> to vector<1x8xf32>
    %11 = vector.shape_cast %10 : vector<1x8xf32> to vector<1x8x1xf32>
    %12 = vector.broadcast %11 : vector<1x8x1xf32> to vector<1x8x8xf32>
    %13 = arith.subf %9, %12 : vector<1x8x8xf32>
    %14 = math.exp %13 : vector<1x8x8xf32>
    %cst_12 = arith.constant dense<0.000000e+00> : vector<1x8xf32>
    %15 = vector.multi_reduction <add>, %14, %cst_12 [2] : vector<1x8x8xf32> to vector<1x8xf32>
    %16 = vector.shape_cast %15 : vector<1x8xf32> to vector<1x8x1xf32>
    %17 = vector.broadcast %16 : vector<1x8x1xf32> to vector<1x8x8xf32>
    %18 = arith.divf %14, %17 : vector<1x8x8xf32>
    %c0_13 = arith.constant 0 : index
    %c0_14 = arith.constant 0 : index
    %c0_15 = arith.constant 0 : index
    %19 = vector.load %arg3[%c0_13, %c0_14, %c0_15] : memref<1x8x8xf32, #tpu.memory_space<vmem>>, vector<1x8x8xf32>
    "tpu.trace_start"() <{level = 10 : i32, message = "bqk,bkd->bqd"}> : () -> ()
    %cst_16 = arith.constant dense<0.000000e+00> : vector<1x8x8xf32>
    %20 = tpu.matmul %18, %19, %cst_16 {dimension_numbers = #tpu.dot_dimension_numbers<[2], [1], [1], [2], [0, 0, 0, 1, 1, 2], [0], [0]>} : vector<1x8x8xf32>, vector<1x8x8xf32>, vector<1x8x8xf32> -> vector<1x8x8xf32>
    "tpu.trace_stop"() : () -> ()
    %c0_17 = arith.constant 0 : index
    %c0_18 = arith.constant 0 : index
    %c0_19 = arith.constant 0 : index
    %21 = vector.load %arg5[%c0_17, %c0_18, %c0_19] : memref<1x8x8xf32, #tpu.memory_space<vmem>>, vector<1x8x8xf32>
    tpu.vector_store %arg5[%c0_17, %c0_18, %c0_19], %20 {strides = array<i32>} : memref<1x8x8xf32, #tpu.memory_space<vmem>>, vector<1x8x8xf32>,
    return
  }
  func.func @transform_0(%arg0: i32) -> (i32, i32, i32) {
    %c0_i32 = arith.constant 0 : i32
    %c0_i32_0 = arith.constant 0 : i32
    %c0_i32_1 = arith.constant 0 : i32
    return %arg0, %c0_i32, %c0_i32_0 : i32, i32, i32
  }
  func.func @transform_1(%arg0: i32) -> (i32, i32, i32) {
    %c0_i32 = arith.constant 0 : i32
    %c0_i32_0 = arith.constant 0 : i32
    %c0_i32_1 = arith.constant 0 : i32
    return %arg0, %c0_i32, %c0_i32_0 : i32, i32, i32
  }
  func.func @transform_2(%arg0: i32) -> (i32, i32, i32) {
    %c0_i32 = arith.constant 0 : i32
    %c0_i32_0 = arith.constant 0 : i32
    %c0_i32_1 = arith.constant 0 : i32
    return %arg0, %c0_i32, %c0_i32_0 : i32, i32, i32
  }
  func.func @transform_3(%arg0: i32) -> (i32, i32, i32) {
    %c0_i32 = arith.constant 0 : i32
    %c0_i32_0 = arith.constant 0 : i32
    %c0_i32_1 = arith.constant 0 : i32
    return %arg0, %c0_i32, %c0_i32_0 : i32, i32, i32
  }
  func.func @transform_4(%arg0: i32) -> (i32, i32, i32) {
    %c0_i32 = arith.constant 0 : i32
    %c0_i32_0 = arith.constant 0 : i32
    %c0_i32_1 = arith.constant 0 : i32
    return %arg0, %c0_i32, %c0_i32_0 : i32, i32, i32
  }
}

module attributes {stable_mosaic.version = 11 : i64} {
  func.func @_ln_mask_kernel(%arg0: i32, %arg1: memref<16x32xf32, #tpu.memory_space<vmem>>, %arg2: memref<1x32xf32, #tpu.memory_space<vmem>>, %arg3: memref<1x32xf32, #tpu.memory_space<vmem>>, %arg4: memref<16x1xf32, #tpu.memory_space<vmem>>, %arg5: memref<16x32xf32, #tpu.memory_space<vmem>>) attributes {dimension_semantics = [#tpu.dimension_semantics<parallel>], iteration_bounds = array<i64: 1>, scalar_prefetch = 0 : i64, scratch_operands = 0 : i64, tpu.core_type = #tpu.core_type<tc>, window_params = [{transform_indices = @transform_0, window_bounds = array<i64: 16, 32>}, {pipeline_mode = #tpu.pipeline_mode<synchronous>, transform_indices = @transform_1, window_bounds = array<i64: 1, 32>}, {pipeline_mode = #tpu.pipeline_mode<synchronous>, transform_indices = @transform_2, window_bounds = array<i64: 1, 32>}, {transform_indices = @transform_3, window_bounds = array<i64: 16, 1>}, {transform_indices = @transform_4, window_bounds = array<i64: 16, 32>}]} {
    %c0 = arith.constant 0 : index
    %c0_0 = arith.constant 0 : index
    %0 = vector.load %arg1[%c0, %c0_0] : memref<16x32xf32, #tpu.memory_space<vmem>>, vector<16x32xf32>
    %cst = arith.constant dense<0.000000e+00> : vector<16xf32>
    %1 = vector.multi_reduction <add>, %0, %cst [1] : vector<16x32xf32> to vector<16xf32>
    %2 = vector.shape_cast %1 : vector<16xf32> to vector<16x1xf32>
    %cst_1 = arith.constant 3.200000e+01 : f32
    %3 = vector.broadcast %cst_1 : f32 to vector<16x1xf32>
    %4 = arith.divf %2, %3 : vector<16x1xf32>
    %5 = vector.broadcast %4 : vector<16x1xf32> to vector<16x32xf32>
    %6 = arith.subf %0, %5 : vector<16x32xf32>
    %7 = arith.mulf %6, %6 : vector<16x32xf32>
    %cst_2 = arith.constant dense<0.000000e+00> : vector<16xf32>
    %8 = vector.multi_reduction <add>, %7, %cst_2 [1] : vector<16x32xf32> to vector<16xf32>
    %9 = vector.shape_cast %8 : vector<16xf32> to vector<16x1xf32>
    %cst_3 = arith.constant 3.200000e+01 : f32
    %10 = vector.broadcast %cst_3 : f32 to vector<16x1xf32>
    %11 = arith.divf %9, %10 : vector<16x1xf32>
    %cst_4 = arith.constant 9.99999974E-6 : f32
    %12 = vector.broadcast %cst_4 : f32 to vector<16x1xf32>
    %13 = arith.addf %11, %12 : vector<16x1xf32>
    %14 = math.rsqrt %13 : vector<16x1xf32>
    %15 = vector.broadcast %14 : vector<16x1xf32> to vector<16x32xf32>
    %16 = arith.mulf %6, %15 : vector<16x32xf32>
    %c0_5 = arith.constant 0 : index
    %c0_6 = arith.constant 0 : index
    %17 = vector.load %arg2[%c0_5, %c0_6] : memref<1x32xf32, #tpu.memory_space<vmem>>, vector<1x32xf32>
    %18 = vector.broadcast %17 : vector<1x32xf32> to vector<16x32xf32>
    %19 = arith.mulf %16, %18 : vector<16x32xf32>
    %c0_7 = arith.constant 0 : index
    %c0_8 = arith.constant 0 : index
    %20 = vector.load %arg3[%c0_7, %c0_8] : memref<1x32xf32, #tpu.memory_space<vmem>>, vector<1x32xf32>
    %21 = vector.broadcast %20 : vector<1x32xf32> to vector<16x32xf32>
    %22 = arith.addf %19, %21 : vector<16x32xf32>
    %c0_9 = arith.constant 0 : index
    %c0_10 = arith.constant 0 : index
    %23 = vector.load %arg4[%c0_9, %c0_10] : memref<16x1xf32, #tpu.memory_space<vmem>>, vector<16x1xf32>
    %24 = vector.broadcast %23 : vector<16x1xf32> to vector<16x32xf32>
    %25 = arith.mulf %22, %24 : vector<16x32xf32>
    %c0_11 = arith.constant 0 : index
    %c0_12 = arith.constant 0 : index
    %26 = vector.load %arg5[%c0_11, %c0_12] : memref<16x32xf32, #tpu.memory_space<vmem>>, vector<16x32xf32>
    tpu.vector_store %arg5[%c0_11, %c0_12], %25 {strides = array<i32>} : memref<16x32xf32, #tpu.memory_space<vmem>>, vector<16x32xf32>,
    return
  }
  func.func @transform_0(%arg0: i32) -> (i32, i32) {
    %c0_i32 = arith.constant 0 : i32
    %c0_i32_0 = arith.constant 0 : i32
    return %arg0, %c0_i32 : i32, i32
  }
  func.func @transform_1(%arg0: i32) -> (i32, i32) {
    %c0_i32 = arith.constant 0 : i32
    %c0_i32_0 = arith.constant 0 : i32
    %c0_i32_1 = arith.constant 0 : i32
    return %c0_i32, %c0_i32_0 : i32, i32
  }
  func.func @transform_2(%arg0: i32) -> (i32, i32) {
    %c0_i32 = arith.constant 0 : i32
    %c0_i32_0 = arith.constant 0 : i32
    %c0_i32_1 = arith.constant 0 : i32
    return %c0_i32, %c0_i32_0 : i32, i32
  }
  func.func @transform_3(%arg0: i32) -> (i32, i32) {
    %c0_i32 = arith.constant 0 : i32
    %c0_i32_0 = arith.constant 0 : i32
    return %arg0, %c0_i32 : i32, i32
  }
  func.func @transform_4(%arg0: i32) -> (i32, i32) {
    %c0_i32 = arith.constant 0 : i32
    %c0_i32_0 = arith.constant 0 : i32
    return %arg0, %c0_i32 : i32, i32
  }
}

module attributes {stable_mosaic.version = 11 : i64} {
  func.func @_linear_kernel(%arg0: i32, %arg1: memref<24x32xf32, #tpu.memory_space<vmem>>, %arg2: memref<32x32xf32, #tpu.memory_space<vmem>>, %arg3: memref<1x32xf32, #tpu.memory_space<vmem>>, %arg4: memref<24x32xf32, #tpu.memory_space<vmem>>) attributes {dimension_semantics = [#tpu.dimension_semantics<parallel>], iteration_bounds = array<i64: 1>, scalar_prefetch = 0 : i64, scratch_operands = 0 : i64, tpu.core_type = #tpu.core_type<tc>, window_params = [{transform_indices = @transform_0, window_bounds = array<i64: 24, 32>}, {pipeline_mode = #tpu.pipeline_mode<synchronous>, transform_indices = @transform_1, window_bounds = array<i64: 32, 32>}, {pipeline_mode = #tpu.pipeline_mode<synchronous>, transform_indices = @transform_2, window_bounds = array<i64: 1, 32>}, {transform_indices = @transform_3, window_bounds = array<i64: 24, 32>}]} {
    %c0 = arith.constant 0 : index
    %c0_0 = arith.constant 0 : index
    %0 = vector.load %arg1[%c0, %c0_0] : memref<24x32xf32, #tpu.memory_space<vmem>>, vector<24x32xf32>
    %c0_1 = arith.constant 0 : index
    %c0_2 = arith.constant 0 : index
    %1 = vector.load %arg2[%c0_1, %c0_2] : memref<32x32xf32, #tpu.memory_space<vmem>>, vector<32x32xf32>
    %cst = arith.constant dense<0.000000e+00> : vector<24x32xf32>
    %2 = tpu.matmul %0, %1, %cst {dimension_numbers = #tpu.dot_dimension_numbers<[1], [0], [0], [1], [0, 0, 1, 1], [], []>} : vector<24x32xf32>, vector<32x32xf32>, vector<24x32xf32> -> vector<24x32xf32>
    %c0_3 = arith.constant 0 : index
    %c0_4 = arith.constant 0 : index
    %3 = vector.load %arg3[%c0_3, %c0_4] : memref<1x32xf32, #tpu.memory_space<vmem>>, vector<1x32xf32>
    %4 = vector.broadcast %3 : vector<1x32xf32> to vector<24x32xf32>
    %5 = arith.addf %2, %4 : vector<24x32xf32>
    %c0_5 = arith.constant 0 : index
    %c0_6 = arith.constant 0 : index
    %6 = vector.load %arg4[%c0_5, %c0_6] : memref<24x32xf32, #tpu.memory_space<vmem>>, vector<24x32xf32>
    tpu.vector_store %arg4[%c0_5, %c0_6], %5 {strides = array<i32>} : memref<24x32xf32, #tpu.memory_space<vmem>>, vector<24x32xf32>,
    return
  }
  func.func @transform_0(%arg0: i32) -> (i32, i32) {
    %c0_i32 = arith.constant 0 : i32
    %c0_i32_0 = arith.constant 0 : i32
    return %arg0, %c0_i32 : i32, i32
  }
  func.func @transform_1(%arg0: i32) -> (i32, i32) {
    %c0_i32 = arith.constant 0 : i32
    %c0_i32_0 = arith.constant 0 : i32
    %c0_i32_1 = arith.constant 0 : i32
    return %c0_i32, %c0_i32_0 : i32, i32
  }
  func.func @transform_2(%arg0: i32) -> (i32, i32) {
    %c0_i32 = arith.constant 0 : i32
    %c0_i32_0 = arith.constant 0 : i32
    %c0_i32_1 = arith.constant 0 : i32
    return %c0_i32, %c0_i32_0 : i32, i32
  }
  func.func @transform_3(%arg0: i32) -> (i32, i32) {
    %c0_i32 = arith.constant 0 : i32
    %c0_i32_0 = arith.constant 0 : i32
    return %arg0, %c0_i32 : i32, i32
  }
}

module attributes {stable_mosaic.version = 11 : i64} {
  func.func @_attn_kernel(%arg0: i32, %arg1: memref<1x8x8xf32, #tpu.memory_space<vmem>>, %arg2: memref<1x12x8xf32, #tpu.memory_space<vmem>>, %arg3: memref<1x12x8xf32, #tpu.memory_space<vmem>>, %arg4: memref<1x8x12xf32, #tpu.memory_space<vmem>>, %arg5: memref<1x8x8xf32, #tpu.memory_space<vmem>>) attributes {dimension_semantics = [#tpu.dimension_semantics<parallel>], iteration_bounds = array<i64: 8>, scalar_prefetch = 0 : i64, scratch_operands = 0 : i64, tpu.core_type = #tpu.core_type<tc>, window_params = [{transform_indices = @transform_0, window_bounds = array<i64: 1, 8, 8>}, {transform_indices = @transform_1, window_bounds = array<i64: 1, 12, 8>}, {transform_indices = @transform_2, window_bounds = array<i64: 1, 12, 8>}, {transform_indices = @transform_3, window_bounds = array<i64: 1, 8, 12>}, {transform_indices = @transform_4, window_bounds = array<i64: 1, 8, 8>}]} {
    %c0 = arith.constant 0 : index
    %c0_0 = arith.constant 0 : index
    %c0_1 = arith.constant 0 : index
    %0 = vector.load %arg1[%c0, %c0_0, %c0_1] : memref<1x8x8xf32, #tpu.memory_space<vmem>>, vector<1x8x8xf32>
    %c0_2 = arith.constant 0 : index
    %c0_3 = arith.constant 0 : index
    %c0_4 = arith.constant 0 : index
    %1 = vector.load %arg2[%c0_2, %c0_3, %c0_4] : memref<1x12x8xf32, #tpu.memory_space<vmem>>, vector<1x12x8xf32>
    "tpu.trace_start"() <{level = 10 : i32, message = "bqd,bkd->bqk"}> : () -> ()
    %cst = arith.constant dense<0.000000e+00> : vector<1x8x12xf32>
    %2 = tpu.matmul %0, %1, %cst {dimension_numbers = #tpu.dot_dimension_numbers<[2], [2], [1], [1], [0, 0, 0, 1, 1, 1], [0], [0]>} : vector<1x8x8xf32>, vector<1x12x8xf32>, vector<1x8x12xf32> -> vector<1x8x12xf32>
    "tpu.trace_stop"() : () -> ()
    %cst_5 = arith.constant 0.353553385 : f32
    %3 = vector.broadcast %cst_5 : f32 to vector<1x8x12xf32>
    %4 = arith.mulf %2, %3 : vector<1x8x12xf32>
    %c0_6 = arith.constant 0 : index
    %c0_7 = arith.constant 0 : index
    %c0_8 = arith.constant 0 : index
    %5 = vector.load %arg4[%c0_6, %c0_7, %c0_8] : memref<1x8x12xf32, #tpu.memory_space<vmem>>, vector<1x8x12xf32>
    %cst_9 = arith.constant 0.000000e+00 : f32
    %6 = vector.broadcast %cst_9 : f32 to vector<1x8x12xf32>
    %7 = arith.cmpf ogt, %5, %6 : vector<1x8x12xf32>
    %cst_10 = arith.constant -1.000000e+30 : f32
    %8 = vector.broadcast %cst_10 : f32 to vector<1x8x12xf32>
    %9 = arith.select %7, %8, %4 : vector<1x8x12xi1>, vector<1x8x12xf32>
    %cst_11 = arith.constant dense<0xFF800000> : vector<1x8xf32>
    %10 = vector.multi_reduction <maximumf>, %9, %cst_11 [2] : vector<1x8x12xf32> to vector<1x8xf32>
    %11 = vector.shape_cast %10 : vector<1x8xf32> to vector<1x8x1xf32>
    %12 = vector.broadcast %11 : vector<1x8x1xf32> to vector<1x8x12xf32>
    %13 = arith.subf %9, %12 : vector<1x8x12xf32>
    %14 = math.exp %13 : vector<1x8x12xf32>
    %cst_12 = arith.constant dense<0.000000e+00> : vector<1x8xf32>
    %15 = vector.multi_reduction <add>, %14, %cst_12 [2] : vector<1x8x12xf32> to vector<1x8xf32>
    %16 = vector.shape_cast %15 : vector<1x8xf32> to vector<1x8x1xf32>
    %17 = vector.broadcast %16 : vector<1x8x1xf32> to vector<1x8x12xf32>
    %18 = arith.divf %14, %17 : vector<1x8x12xf32>
    %c0_13 = arith.constant 0 : index
    %c0_14 = arith.constant 0 : index
    %c0_15 = arith.constant 0 : index
    %19 = vector.load %arg3[%c0_13, %c0_14, %c0_15] : memref<1x12x8xf32, #tpu.memory_space<vmem>>, vector<1x12x8xf32>
    "tpu.trace_start"() <{level = 10 : i32, message = "bqk,bkd->bqd"}> : () -> ()
    %cst_16 = arith.constant dense<0.000000e+00> : vector<1x8x8xf32>
    %20 = tpu.matmul %18, %19, %cst_16 {dimension_numbers = #tpu.dot_dimension_numbers<[2], [1], [1], [2], [0, 0, 0, 1, 1, 2], [0], [0]>} : vector<1x8x12xf32>, vector<1x12x8xf32>, vector<1x8x8xf32> -> vector<1x8x8xf32>
    "tpu.trace_stop"() : () -> ()
    %c0_17 = arith.constant 0 : index
    %c0_18 = arith.constant 0 : index
    %c0_19 = arith.constant 0 : index
    %21 = vector.load %arg5[%c0_17, %c0_18, %c0_19] : memref<1x8x8xf32, #tpu.memory_space<vmem>>, vector<1x8x8xf32>
    tpu.vector_store %arg5[%c0_17, %c0_18, %c0_19], %20 {strides = array<i32>} : memref<1x8x8xf32, #tpu.memory_space<vmem>>, vector<1x8x8xf32>,
    return
  }
  func.func @transform_0(%arg0: i32) -> (i32, i32, i32) {
    %c0_i32 = arith.constant 0 : i32
    %c0_i32_0 = arith.constant 0 : i32
    %c0_i32_1 = arith.constant 0 : i32
    return %arg0, %c0_i32, %c0_i32_0 : i32, i32, i32
  }
  func.func @transform_1(%arg0: i32) -> (i32, i32, i32) {
    %c0_i32 = arith.constant 0 : i32
    %c0_i32_0 = arith.constant 0 : i32
    %c0_i32_1 = arith.constant 0 : i32
    return %arg0, %c0_i32, %c0_i32_0 : i32, i32, i32
  }
  func.func @transform_2(%arg0: i32) -> (i32, i32, i32) {
    %c0_i32 = arith.constant 0 : i32
    %c0_i32_0 = arith.constant 0 : i32
    %c0_i32_1 = arith.constant 0 : i32
    return %arg0, %c0_i32, %c0_i32_0 : i32, i32, i32
  }
  func.func @transform_3(%arg0: i32) -> (i32, i32, i32) {
    %c0_i32 = arith.constant 0 : i32
    %c0_i32_0 = arith.constant 0 : i32
    %c0_i32_1 = arith.constant 0 : i32
    return %arg0, %c0_i32, %c0_i32_0 : i32, i32, i32
  }
  func.func @transform_4(%arg0: i32) -> (i32, i32, i32) {
    %c0_i32 = arith.constant 0 : i32
    %c0_i32_0 = arith.constant 0 : i32
    %c0_i32_1 = arith.constant 0 : i32
    return %arg0, %c0_i32, %c0_i32_0 : i32, i32, i32
  }
}

module attributes {stable_mosaic.version = 11 : i64} {
  func.func @_ffn_kernel(%arg0: i32, %arg1: memref<16x32xf32, #tpu.memory_space<vmem>>, %arg2: memref<32x64xf32, #tpu.memory_space<vmem>>, %arg3: memref<1x64xf32, #tpu.memory_space<vmem>>, %arg4: memref<64x32xf32, #tpu.memory_space<vmem>>, %arg5: memref<1x32xf32, #tpu.memory_space<vmem>>, %arg6: memref<16x32xf32, #tpu.memory_space<vmem>>) attributes {dimension_semantics = [#tpu.dimension_semantics<parallel>], iteration_bounds = array<i64: 1>, scalar_prefetch = 0 : i64, scratch_operands = 0 : i64, tpu.core_type = #tpu.core_type<tc>, window_params = [{transform_indices = @transform_0, window_bounds = array<i64: 16, 32>}, {pipeline_mode = #tpu.pipeline_mode<synchronous>, transform_indices = @transform_1, window_bounds = array<i64: 32, 64>}, {pipeline_mode = #tpu.pipeline_mode<synchronous>, transform_indices = @transform_2, window_bounds = array<i64: 1, 64>}, {pipeline_mode = #tpu.pipeline_mode<synchronous>, transform_indices = @transform_3, window_bounds = array<i64: 64, 32>}, {pipeline_mode = #tpu.pipeline_mode<synchronous>, transform_indices = @transform_4, window_bounds = array<i64: 1, 32>}, {transform_indices = @transform_5, window_bounds = array<i64: 16, 32>}]} {
    %c0 = arith.constant 0 : index
    %c0_0 = arith.constant 0 : index
    %0 = vector.load %arg1[%c0, %c0_0] : memref<16x32xf32, #tpu.memory_space<vmem>>, vector<16x32xf32>
    %c0_1 = arith.constant 0 : index
    %c0_2 = arith.constant 0 : index
    %1 = vector.load %arg2[%c0_1, %c0_2] : memref<32x64xf32, #tpu.memory_space<vmem>>, vector<32x64xf32>
    %cst = arith.constant dense<0.000000e+00> : vector<16x64xf32>
    %2 = tpu.matmul %0, %1, %cst {dimension_numbers = #tpu.dot_dimension_numbers<[1], [0], [0], [1], [0, 0, 1, 1], [], []>} : vector<16x32xf32>, vector<32x64xf32>, vector<16x64xf32> -> vector<16x64xf32>
    %c0_3 = arith.constant 0 : index
    %c0_4 = arith.constant 0 : index
    %3 = vector.load %arg3[%c0_3, %c0_4] : memref<1x64xf32, #tpu.memory_space<vmem>>, vector<1x64xf32>
    %4 = vector.broadcast %3 : vector<1x64xf32> to vector<16x64xf32>
    %5 = arith.addf %2, %4 : vector<16x64xf32>
    %cst_5 = arith.constant 0.000000e+00 : f32
    %6 = vector.broadcast %cst_5 : f32 to vector<16x64xf32>
    %7 = arith.maximumf %5, %6 : vector<16x64xf32>
    %c0_6 = arith.constant 0 : index
    %c0_7 = arith.constant 0 : index
    %8 = vector.load %arg4[%c0_6, %c0_7] : memref<64x32xf32, #tpu.memory_space<vmem>>, vector<64x32xf32>
    %cst_8 = arith.constant dense<0.000000e+00> : vector<16x32xf32>
    %9 = tpu.matmul %7, %8, %cst_8 {dimension_numbers = #tpu.dot_dimension_numbers<[1], [0], [0], [1], [0, 0, 1, 1], [], []>} : vector<16x64xf32>, vector<64x32xf32>, vector<16x32xf32> -> vector<16x32xf32>
    %c0_9 = arith.constant 0 : index
    %c0_10 = arith.constant 0 : index
    %10 = vector.load %arg5[%c0_9, %c0_10] : memref<1x32xf32, #tpu.memory_space<vmem>>, vector<1x32xf32>
    %11 = vector.broadcast %10 : vector<1x32xf32> to vector<16x32xf32>
    %12 = arith.addf %9, %11 : vector<16x32xf32>
    %c0_11 = arith.constant 0 : index
    %c0_12 = arith.constant 0 : index
    %13 = vector.load %arg6[%c0_11, %c0_12] : memref<16x32xf32, #tpu.memory_space<vmem>>, vector<16x32xf32>
    tpu.vector_store %arg6[%c0_11, %c0_12], %12 {strides = array<i32>} : memref<16x32xf32, #tpu.memory_space<vmem>>, vector<16x32xf32>,
    return
  }
  func.func @transform_0(%arg0: i32) -> (i32, i32) {
    %c0_i32 = arith.constant 0 : i32
    %c0_i32_0 = arith.constant 0 : i32
    return %arg0, %c0_i32 : i32, i32
  }
  func.func @transform_1(%arg0: i32) -> (i32, i32) {
    %c0_i32 = arith.constant 0 : i32
    %c0_i32_0 = arith.constant 0 : i32
    %c0_i32_1 = arith.constant 0 : i32
    return %c0_i32, %c0_i32_0 : i32, i32
  }
  func.func @transform_2(%arg0: i32) -> (i32, i32) {
    %c0_i32 = arith.constant 0 : i32
    %c0_i32_0 = arith.constant 0 : i32
    %c0_i32_1 = arith.constant 0 : i32
    return %c0_i32, %c0_i32_0 : i32, i32
  }
  func.func @transform_3(%arg0: i32) -> (i32, i32) {
    %c0_i32 = arith.constant 0 : i32
    %c0_i32_0 = arith.constant 0 : i32
    %c0_i32_1 = arith.constant 0 : i32
    return %c0_i32, %c0_i32_0 : i32, i32
  }
  func.func @transform_4(%arg0: i32) -> (i32, i32) {
    %c0_i32 = arith.constant 0 : i32
    %c0_i32_0 = arith.constant 0 : i32
    %c0_i32_1 = arith.constant 0 : i32
    return %c0_i32, %c0_i32_0 : i32, i32
  }
  func.func @transform_5(%arg0: i32) -> (i32, i32) {
    %c0_i32 = arith.constant 0 : i32
    %c0_i32_0 = arith.constant 0 : i32
    return %arg0, %c0_i32 : i32, i32
  }
}

module attributes {stable_mosaic.version = 11 : i64} {
  func.func @_ln_mask_kernel(%arg0: i32, %arg1: memref<16x32xf32, #tpu.memory_space<vmem>>, %arg2: memref<1x32xf32, #tpu.memory_space<vmem>>, %arg3: memref<1x32xf32, #tpu.memory_space<vmem>>, %arg4: memref<16x1xf32, #tpu.memory_space<vmem>>, %arg5: memref<16x32xf32, #tpu.memory_space<vmem>>) attributes {dimension_semantics = [#tpu.dimension_semantics<parallel>], iteration_bounds = array<i64: 1>, scalar_prefetch = 0 : i64, scratch_operands = 0 : i64, tpu.core_type = #tpu.core_type<tc>, window_params = [{transform_indices = @transform_0, window_bounds = array<i64: 16, 32>}, {pipeline_mode = #tpu.pipeline_mode<synchronous>, transform_indices = @transform_1, window_bounds = array<i64: 1, 32>}, {pipeline_mode = #tpu.pipeline_mode<synchronous>, transform_indices = @transform_2, window_bounds = array<i64: 1, 32>}, {transform_indices = @transform_3, window_bounds = array<i64: 16, 1>}, {transform_indices = @transform_4, window_bounds = array<i64: 16, 32>}]} {
    %c0 = arith.constant 0 : index
    %c0_0 = arith.constant 0 : index
    %0 = vector.load %arg1[%c0, %c0_0] : memref<16x32xf32, #tpu.memory_space<vmem>>, vector<16x32xf32>
    %cst = arith.constant dense<0.000000e+00> : vector<16xf32>
    %1 = vector.multi_reduction <add>, %0, %cst [1] : vector<16x32xf32> to vector<16xf32>
    %2 = vector.shape_cast %1 : vector<16xf32> to vector<16x1xf32>
    %cst_1 = arith.constant 3.200000e+01 : f32
    %3 = vector.broadcast %cst_1 : f32 to vector<16x1xf32>
    %4 = arith.divf %2, %3 : vector<16x1xf32>
    %5 = vector.broadcast %4 : vector<16x1xf32> to vector<16x32xf32>
    %6 = arith.subf %0, %5 : vector<16x32xf32>
    %7 = arith.mulf %6, %6 : vector<16x32xf32>
    %cst_2 = arith.constant dense<0.000000e+00> : vector<16xf32>
    %8 = vector.multi_reduction <add>, %7, %cst_2 [1] : vector<16x32xf32> to vector<16xf32>
    %9 = vector.shape_cast %8 : vector<16xf32> to vector<16x1xf32>
    %cst_3 = arith.constant 3.200000e+01 : f32
    %10 = vector.broadcast %cst_3 : f32 to vector<16x1xf32>
    %11 = arith.divf %9, %10 : vector<16x1xf32>
    %cst_4 = arith.constant 9.99999974E-6 : f32
    %12 = vector.broadcast %cst_4 : f32 to vector<16x1xf32>
    %13 = arith.addf %11, %12 : vector<16x1xf32>
    %14 = math.rsqrt %13 : vector<16x1xf32>
    %15 = vector.broadcast %14 : vector<16x1xf32> to vector<16x32xf32>
    %16 = arith.mulf %6, %15 : vector<16x32xf32>
    %c0_5 = arith.constant 0 : index
    %c0_6 = arith.constant 0 : index
    %17 = vector.load %arg2[%c0_5, %c0_6] : memref<1x32xf32, #tpu.memory_space<vmem>>, vector<1x32xf32>
    %18 = vector.broadcast %17 : vector<1x32xf32> to vector<16x32xf32>
    %19 = arith.mulf %16, %18 : vector<16x32xf32>
    %c0_7 = arith.constant 0 : index
    %c0_8 = arith.constant 0 : index
    %20 = vector.load %arg3[%c0_7, %c0_8] : memref<1x32xf32, #tpu.memory_space<vmem>>, vector<1x32xf32>
    %21 = vector.broadcast %20 : vector<1x32xf32> to vector<16x32xf32>
    %22 = arith.addf %19, %21 : vector<16x32xf32>
    %c0_9 = arith.constant 0 : index
    %c0_10 = arith.constant 0 : index
    %23 = vector.load %arg4[%c0_9, %c0_10] : memref<16x1xf32, #tpu.memory_space<vmem>>, vector<16x1xf32>
    %24 = vector.broadcast %23 : vector<16x1xf32> to vector<16x32xf32>
    %25 = arith.mulf %22, %24 : vector<16x32xf32>
    %c0_11 = arith.constant 0 : index
    %c0_12 = arith.constant 0 : index
    %26 = vector.load %arg5[%c0_11, %c0_12] : memref<16x32xf32, #tpu.memory_space<vmem>>, vector<16x32xf32>
    tpu.vector_store %arg5[%c0_11, %c0_12], %25 {strides = array<i32>} : memref<16x32xf32, #tpu.memory_space<vmem>>, vector<16x32xf32>,
    return
  }
  func.func @transform_0(%arg0: i32) -> (i32, i32) {
    %c0_i32 = arith.constant 0 : i32
    %c0_i32_0 = arith.constant 0 : i32
    return %arg0, %c0_i32 : i32, i32
  }
  func.func @transform_1(%arg0: i32) -> (i32, i32) {
    %c0_i32 = arith.constant 0 : i32
    %c0_i32_0 = arith.constant 0 : i32
    %c0_i32_1 = arith.constant 0 : i32
    return %c0_i32, %c0_i32_0 : i32, i32
  }
  func.func @transform_2(%arg0: i32) -> (i32, i32) {
    %c0_i32 = arith.constant 0 : i32
    %c0_i32_0 = arith.constant 0 : i32
    %c0_i32_1 = arith.constant 0 : i32
    return %c0_i32, %c0_i32_0 : i32, i32
  }
  func.func @transform_3(%arg0: i32) -> (i32, i32) {
    %c0_i32 = arith.constant 0 : i32
    %c0_i32_0 = arith.constant 0 : i32
    return %arg0, %c0_i32 : i32, i32
  }
  func.func @transform_4(%arg0: i32) -> (i32, i32) {
    %c0_i32 = arith.constant 0 : i32
    %c0_i32_0 = arith.constant 0 : i32
    return %arg0, %c0_i32 : i32, i32
  }
}

</mosaic_0001>

<bundles_post_ra>
// kernel: node_decoder_layer.14
= control target key start
LH: loop header
LB: loop body
LE: loop exit
PB: predicated region body
PF: predicated region fallthrough
CT: control target
= control target key end

     0   :  { %vm27_vm0 = vcmask 261120   ;;  %s194_s1 = inlined_call_operand.vmem [shape: f32[32,32], index: 1, kind: input, shape index: {}]   ;;  %s195_s0 = inlined_call_operand.vmem [shape: f32[16,32], index: 0, kind: input, shape index: {}]   ;;  %s196_s2 = inlined_call_operand.vmem [shape: f32[1,32], index: 2, kind: input, shape index: {}]   ;;  %s197_s3 = inlined_call_operand.vmem [shape: f32[16,32], index: 3, kind: output, shape index: {}]  }
   0x1   :  { %v16_v0 = vld [vmem:[%s194_s1] sm:$0xff]  ;;  %v17_v1 = vld [vmem:[%s194_s1 + $0x8] sm:$0xff]  ;;  %v18_v2 = vld [vmem:[%s194_s1 + $0x10] sm:$0xff] }
   0x2   :  { %v135_v3 = vpack.c.bf16 %v17_v1, %v16_v0  ;;  %v19_v4 = vld [vmem:[%s194_s1 + $0x18] sm:$0xff]  ;;  %v14_v5 = vld [vmem:[%s195_s0] sm:$0xff]  ;;  %v15_v7 = vld [vmem:[%s195_s0 + $0x8] sm:$0xff] }
   0x3   :  { %v139_v6 = vpack.c.bf16 %v19_v4, %v18_v2  ;;  %132 = vmatprep.mubr.msk.f32.mxu0 %vm27_vm0, %v14_v5  ;;  %v115_v8 = vld [vmem:[%s196_s2] ss:$0 sm:$0xff] }
   0x4   :  { %136 = vmatprep.subr.bf16.mxu0 %v135_v3 }
   0x5   :  { %138 = vmatpush3.bf16.msra.mxu0 %v135_v3 }
   0x6   :  { %140 = vmatprep.subr.bf16.mxu0 %v139_v6 }
   0x9   :  { %142 = vmatpush3.bf16.msra.mxu0 %v139_v6 }
   0xc   :  { %133 = vmatmul.mubr.msk.f32.vlgmr.msra.gmra.mrb[0].mxu0 %vm27_vm0, %v15_v7 }
  0xdf   :  { %v134_v9 = vpop.f32.mrb[0].mxu0 }
  0xe0   :  { %v106_v10 = vadd.f32 %v134_v9, %v115_v8  ;;  %v100_v11 = vpop.f32.mrb[1].mxu0 }
  0xe1   :  { %v101_v12 = vadd.f32 %v115_v8, %v100_v11 }
  0xe2   :  { %110 = vst.msk [vmem:[%s197_s3 + $0x8] sm:$0xff] %vm27_vm0, %v106_v10 }
  0xe3   :  { %109 = vst.msk [vmem:[%s197_s3] sm:$0xff] %vm27_vm0, %v101_v12 }

// kernel: node_decoder_layer.17
= control target key start
LH: loop header
LB: loop body
LE: loop exit
PB: predicated region body
PF: predicated region fallthrough
CT: control target
= control target key end

     0   :  { %s580_s15 = smov 0   ;;  %s619_s0 = inlined_call_operand.vmem [shape: f32[8,8,8], index: 0, kind: input, shape index: {}]   ;;  %s620_s1 = inlined_call_operand.vmem [shape: f32[8,8,8], index: 1, kind: input, shape index: {}]   ;;  %s621_s2 = inlined_call_operand.vmem [shape: f32[8,8,8], index: 2, kind: input, shape index: {}]   ;;  %s622_s3 = inlined_call_operand.vmem [shape: f32[8,8,8], index: 3, kind: input, shape index: {}]   ;;  %s623_s4 = inlined_call_operand.vmem [shape: f32[8,8,8], index: 4, kind: output, shape index: {}]  }
   0x1 LB: > { %s502_s16 = sadd.s32 4294967295, %s551_s15   ;;  %p506_p0 = scmp.ge.s32.totalorder %s551_s15, 1  ;;  %s551_s15 = sphi %s580_s15, %s14_s15  }
   0x2   : > { %p188_p1 = scmp.lt.s32.totalorder %s551_s15, 9 }
   0x4   : > { %p189_p2 = pnand %p506_p0, %p188_p1 }
   0x5   : > { %p224_p3 = scmp.lt.s32.totalorder (!%p189_p2), %s502_s16, 7  ;;  %v553_v0 = vmov (!%p189_p2), 0.0   ;;  %vm554_vm0 = vmmov (!%p189_p2), 0   ;;  %vm246_vm1 = vcmask (!%p189_p2), 64512  }
   0x6   : > { %192 = sbr.rel (%p189_p2) target bundleno = 762 (0x2fa), region = 36  ;;  %521 = vmatprep.subr.mxu0 (!%p189_p2), %v553_v0  ;;  %523 = vmatprep.mubr.msk.f32.mxu0 (!%p189_p2), %vm554_vm0, %v553_v0 }
   0x7   : > { %526 = vmatprep.subr.mxu1 (!%p189_p2), %v553_v0  ;;  %528 = vmatprep.mubr.msk.f32.mxu1 (!%p189_p2), %vm554_vm0, %v553_v0 }
   0xd   : > { %s625_s16 = smov (!%p224_p3, %s502_s16), 7 }
   0xe   : > { %s588_s17 = sshll.u32 %s625_s16, 3 }
   0xf   : > { %s231_s20 = scalar_lea.vmem %s620_s1, %s588_s17  ;;  %s227_s23 = scalar_lea.vmem %s619_s0, %s588_s17 }
  0x10   : > { %v245_v1 = vld [vmem:[%s231_s20] sm:$0xff]  ;;  %s239_s26 = scalar_lea.vmem %s622_s3, %s588_s17  ;;  %s235_s29 = scalar_lea.vmem %s621_s2, %s588_s17 }
  0x11   : > { %522 = vmatpush3.xpose.msk.msra.mxu0 %vm246_vm1, %v245_v1  ;;  %v244_v2 = vld [vmem:[%s227_s23] sm:$0xff]  ;;  %s243_s6 = scalar_lea.vmem %s623_s4, %s588_s17 }
  0x12   : > { %v324_v3 = vld [vmem:[%s239_s26] sm:$0xff] }
  0x13   : > { %vm325_vm2 = vcmp.gt.f32.partialorder %v324_v3, 0.0  ;;  %v338_v14 = vld [vmem:[%s235_s29] sm:$0xff] }
  0x14   : > { %524 = vmatmul.mubr.msk.f32.vlgmr.msra.gmra.mrb[0].mxu0 %vm246_vm1, %v244_v2  ;;  %527 = vmatpush3.msra.mxu1 %v338_v14 }
  0xe7   : > { %v319_v4 = vpop.f32.mrb[0].mxu0 }
  0xe8   : > { %v323_v5 = vmul.f32 0.35355338, %v319_v4  ;;  %v525_v6 = vpop.f32.mrb[1].mxu0 }
  0xea   : > { %v326_v7 = vsel %vm325_vm2, -1e+30, %v323_v5 }
  0xeb   : > { %v327_v8 = vsel %vm246_vm1, %v326_v7, -inf }
  0xec   : > { %328 = vmax.xlane.f32.xlu0 %v327_v8 }
 0x179   : > { %v329_v9 = vpop.xlane.xlu0 %328 }
 0x17a   : > { %v330_v10 = vsub.f32 %v326_v7, %v329_v9 }
 0x17c   : > { %v331_v11 = vmul.f32 1.442695, %v330_v10 }
 0x17e   : > { %541 = vpow2.f32 %v331_v11 }
 0x188   : > { %v542_v12 = vpop.eup %541 }
 0x189   : > { %v333_v13 = vsel %vm246_vm1, %v542_v12, 0.0 }
 0x18a   : > { %334 = vadd.xlane.f32.xlu0 %v333_v13 }
 0x217   : > { %v335_v15 = vpop.xlane.xlu0 %334 }
 0x218   : > { %543 = vrcp.f32 %v335_v15 }
 0x222   : > { %v544_v16 = vpop.eup %543 }
 0x223   : > { %v337_v17 = vmul.f32 %v544_v16, %v542_v12 }
 0x225   : > { %529 = vmatmul.mubr.msk.f32.vlgmr.msra.gmra.mrb[0].mxu1 %vm246_vm1, %v337_v17 }
 0x2f8   : > { %v408_v18 = vpop.f32.mrb[0].mxu1 }
 0x2f9   : > { %412 = vst.msk [vmem:[%s243_s6] sm:$0xff] %vm246_vm1, %v408_v18  ;;  %v530_v19 = vpop.f32.mrb[1].mxu1 }
 0x2fa PF: > { %s14_s15 = sadd.s32 1, %s551_s15  }
 0x2fb   : > { %p11_p4 = scmp.ge.s32.totalorder %s14_s15, 10  }
 0x2fd   :  { %13 = sbr.rel (!%p11_p4) target bundleno = 1 (0x1), region = 75 }

// kernel: node_decoder_layer.19
= control target key start
LH: loop header
LB: loop body
LE: loop exit
PB: predicated region body
PF: predicated region fallthrough
CT: control target
= control target key end

     0   :  { %vm19_vm0 = vcmask 261120   ;;  %v94_v4 = vmov 0   ;;  %s150_s0 = inlined_call_operand.vmem [shape: f32[16,32], index: 0, kind: input, shape index: {}]   ;;  %s151_s3 = inlined_call_operand.vmem [shape: f32[16,1], index: 3, kind: input, shape index: {}]   ;;  %s152_s1 = inlined_call_operand.vmem [shape: f32[1,32], index: 1, kind: input, shape index: {}]   ;;  %s153_s2 = inlined_call_operand.vmem [shape: f32[1,32], index: 2, kind: input, shape index: {}]   ;;  %s154_s4 = inlined_call_operand.vmem [shape: f32[16,32], index: 4, kind: output, shape index: {}]  }
   0x1   :  { %v17_v0 = vld [vmem:[%s150_s0] sm:$0xff]  ;;  %v18_v1 = vld [vmem:[%s150_s0 + $0x8] sm:$0xff]  ;;  %88 = vset.pattern.permute.xlu0 %v94_v4  ;;  %89 = vset.pattern.permute.xlu1 %v94_v4 }
   0x2   :  { %v20_v2 = vsel %vm19_vm0, %v17_v0, 0.0  ;;  %v23_v3 = vsel %vm19_vm0, %v18_v1, 0.0  ;;  %v65_v5 = vld [vmem:[%s151_s3] sm:$0xff]  ;;  %v66_v16 = vld [vmem:[%s151_s3 + $0x8] sm:$0xff] }
   0x3   :  { %21 = vadd.xlane.f32.xlu0 %v20_v2  ;;  %v85_v24 = vld [vmem:[%s152_s1] ss:$0 sm:$0xff] }
   0x4   :  { %v86_v26 = vld [vmem:[%s153_s2] ss:$0 sm:$0xff] }
   0x7   :  { %24 = vadd.xlane.f32.xlu0 %v23_v3 }
  0x1d   :  { %69 = vperm.xlu0 %88, %v65_v5  }
  0x90   :  { %v22_v6 = vpop.xlane.xlu0 %21 }
  0x91   :  { %v27_v7 = vmul.f32 0.03125, %v22_v6 }
  0x93   :  { %v29_v8 = vsub.f32 %v17_v0, %v27_v7 }
  0x94   :  { %v25_v9 = vpop.xlane.xlu0 %24 }
  0x95   :  { %v28_v10 = vmul.f32 0.03125, %v25_v9  ;;  %v31_v11 = vmul.f32 %v29_v8, %v29_v8 }
  0x97   :  { %v30_v12 = vsub.f32 %v18_v1, %v28_v10  ;;  %v33_v13 = vsel %vm19_vm0, %v31_v11, 0.0 }
  0x98   :  { %34 = vadd.xlane.f32.xlu1 %v33_v13 }
  0x99   :  { %v32_v14 = vmul.f32 %v30_v12, %v30_v12 }
  0x9b   :  { %v36_v15 = vsel %vm19_vm0, %v32_v14, 0.0 }
  0x9c   :  { %37 = vadd.xlane.f32.xlu1 %v36_v15  ;;  %v70_v29 = vpop.permute.xlu0 %69 }
  0xad   :  { %74 = vperm.xlu1 %89, %v66_v16  }
 0x125   :  { %v35_v17 = vpop.xlane.xlu1 %34 }
 0x126   :  { %v39_v18 = vmul.f32 0.03125, %v35_v17 }
 0x128   :  { %v41_v19 = vadd.f32 1e-05, %v39_v18 }
 0x129   :  { %v38_v20 = vpop.xlane.xlu1 %37 }
 0x12a   :  { %90 = vrsqrt.f32 %v41_v19  ;;  %v40_v21 = vmul.f32 0.03125, %v38_v20 }
 0x12c   :  { %v42_v22 = vadd.f32 1e-05, %v40_v21 }
 0x12d   :  { %v75_v34 = vpop.permute.xlu1 %74 }
 0x12e   :  { %92 = vrsqrt.f32 %v42_v22 }
 0x134   :  { %v91_v23 = vpop.eup %90 }
 0x135   :  { %v45_v25 = vmul.f32 %v91_v23, %v29_v8 }
 0x137   :  { %v54_v27 = vmul.f32 %v85_v24, %v45_v25 }
 0x138   :  { %v93_v28 = vpop.eup %92 }
 0x139   :  { %v63_v30 = vadd.f32 %v86_v26, %v54_v27  ;;  %v46_v31 = vmul.f32 %v93_v28, %v30_v12 }
 0x13b   :  { %v77_v32 = vmul.f32 %v70_v29, %v63_v30  ;;  %v55_v33 = vmul.f32 %v85_v24, %v46_v31 }
 0x13d   :  { %79 = vst.msk [vmem:[%s154_s4] sm:$0xff] %vm19_vm0, %v77_v32  ;;  %v64_v35 = vadd.f32 %v86_v26, %v55_v33 }
 0x13f   :  { %v78_v36 = vmul.f32 %v75_v34, %v64_v35 }
 0x141   :  { %80 = vst.msk [vmem:[%s154_s4 + $0x8] sm:$0xff] %vm19_vm0, %v78_v36 }

// kernel: node_decoder_layer.21
= control target key start
LH: loop header
LB: loop body
LE: loop exit
PB: predicated region body
PF: predicated region fallthrough
CT: control target
= control target key end

     0   :  { %v166_v0 = vmov 0.0|0.0   ;;  %vm167_vm0 = vmmov 0   ;;  %v168_v6 = vmov 0.0   ;;  %vm28_vm1 = vcmask 261120   ;;  %s231_s1 = inlined_call_operand.vmem [shape: f32[32,32], index: 1, kind: input, shape index: {}]   ;;  %s232_s0 = inlined_call_operand.vmem [shape: f32[24,32], index: 0, kind: input, shape index: {}]   ;;  %s233_s2 = inlined_call_operand.vmem [shape: f32[1,32], index: 2, kind: input, shape index: {}]   ;;  %s234_s3 = inlined_call_operand.vmem [shape: f32[24,32], index: 3, kind: output, shape index: {}]  }
   0x1   :  { %159 = vmatprep.subr.bf16.mxu1 %v166_v0  ;;  %v17_v1 = vld [vmem:[%s231_s1] sm:$0xff]  ;;  %v18_v2 = vld [vmem:[%s231_s1 + $0x8] sm:$0xff]  ;;  %153 = vmatprep.subr.bf16.mxu0 %v166_v0  ;;  %v19_v3 = vld [vmem:[%s231_s1 + $0x10] sm:$0xff] }
   0x2   :  { %v154_v4 = vpack.c.bf16 %v18_v2, %v17_v1  ;;  %v20_v5 = vld [vmem:[%s231_s1 + $0x18] sm:$0xff]  ;;  %147 = vmatprep.mubr.msk.f32.mxu1 %vm167_vm0, %v168_v6  ;;  %144 = vmatprep.mubr.msk.f32.mxu0 %vm167_vm0, %v168_v6  ;;  %v15_v8 = vld [vmem:[%s232_s0 + $0x8] sm:$0xff]  ;;  %v14_v9 = vld [vmem:[%s232_s0] sm:$0xff] }
   0x3   :  { %v157_v7 = vpack.c.bf16 %v20_v5, %v19_v3  ;;  %v16_v10 = vld [vmem:[%s232_s0 + $0x10] sm:$0xff]  ;;  %v125_v11 = vld [vmem:[%s233_s2] ss:$0 sm:$0xff] }
   0x4   :  { %161 = vmatpush3.bf16.msra.mxu1 %v154_v4  ;;  %155 = vmatpush3.bf16.msra.mxu0 %v154_v4 }
   0x5   :  { %160 = vmatprep.subr.bf16.mxu1 %v166_v0  ;;  %156 = vmatprep.subr.bf16.mxu0 %v166_v0 }
   0x8   :  { %162 = vmatpush3.bf16.msra.mxu1 %v157_v7  ;;  %158 = vmatpush3.bf16.msra.mxu0 %v157_v7 }
   0xb   :  { %148 = vmatmul.mubr.msk.f32.vlgmr.msra.gmra.mrb[0].mxu1 %vm28_vm1, %v15_v8  ;;  %145 = vmatmul.mubr.msk.f32.vlgmr.msra.gmra.mrb[0].mxu0 %vm28_vm1, %v14_v9 }
   0xc   :  { %150 = vmatprep.mubr.msk.f32.mxu1 %vm167_vm0, %v168_v6 }
   0xf   :  { %151 = vmatmul.mubr.msk.f32.gmra.mrb[2].mxu1 %vm28_vm1, %v16_v10 }
  0xde   :  { %v109_v12 = vpop.f32.mrb[0].mxu1  ;;  %v104_v13 = vpop.f32.mrb[0].mxu0 }
  0xdf   :  { %v110_v14 = vadd.f32 %v125_v11, %v109_v12  ;;  %v149_v15 = vpop.f32.mrb[1].mxu1  ;;  %v105_v16 = vadd.f32 %v125_v11, %v104_v13  ;;  %v146_v17 = vpop.f32.mrb[1].mxu0 }
  0xe1   :  { %119 = vst.msk [vmem:[%s234_s3 + $0x8] sm:$0xff] %vm28_vm1, %v110_v14  ;;  %118 = vst.msk [vmem:[%s234_s3] sm:$0xff] %vm28_vm1, %v105_v16 }
  0xe2   :  { %v114_v18 = vpop.f32.mrb[2].mxu1 }
  0xe3   :  { %v115_v19 = vadd.f32 %v125_v11, %v114_v18  ;;  %v152_v20 = vpop.f32.mrb[3].mxu1 }
  0xe5   :  { %120 = vst.msk [vmem:[%s234_s3 + $0x10] sm:$0xff] %vm28_vm1, %v115_v19 }

// kernel: node_decoder_layer.27
= control target key start
LH: loop header
LB: loop body
LE: loop exit
PB: predicated region body
PF: predicated region fallthrough
CT: control target
= control target key end

     0   :  { %vm20_vm0 = vcmask 261120   ;;  %s199_s0 = inlined_call_operand.vmem [shape: f32[16,32], index: 0, kind: input, shape index: {}]   ;;  %s200_s1 = inlined_call_operand.vmem [shape: f32[1,32], index: 1, kind: input, shape index: {}]   ;;  %s201_s2 = inlined_call_operand.vmem [shape: f32[1,32], index: 2, kind: input, shape index: {}]   ;;  %s202_s3 = inlined_call_operand.vmem [shape: f32[16,1], index: 3, kind: input, shape index: {}]   ;;  %s203_s4 = inlined_call_operand.hbm [shape: f32[16,32], index: 4, kind: output, shape index: {}]  }
   0x1   :  { %v18_v0 = vld [vmem:[%s199_s0] sm:$0xff]  ;;  %v19_v1 = vld [vmem:[%s199_s0 + $0x8] sm:$0xff] }
   0x2   :  { %9 = vsyncpa [#allocation3], 0  ;;  %v21_v2 = vsel %vm20_vm0, %v18_v0, 0.0  ;;  %v24_v3 = vsel %vm20_vm0, %v19_v1, 0.0  ;;  %v66_v4 = vld [vmem:[%s202_s3] sm:$0xff]  ;;  %v134_v5 = vmov 0  }
   0x3   :  { %22 = vadd.xlane.f32.xlu0 %v21_v2  ;;  %105 = vset.pattern.permute.xlu1 %v134_v5  ;;  %v67_v16 = vld [vmem:[%s202_s3 + $0x8] sm:$0xff]  ;;  %v98_v24 = vld [vmem:[%s200_s1] ss:$0 sm:$0xff]  ;;  %s135_s3 = smov [#allocation2]  }
   0x4   :  { %104 = vset.pattern.permute.xlu0 %v134_v5  ;;  %v99_v26 = vld [vmem:[%s201_s2] ss:$0 sm:$0xff]  ;;  %s87_s26 = sshll.u32 %s135_s3, 4  ;;  %s88_s26 = int_to_ptr.vmem [resolvable:$true] %s87_s26 }
   0x5   :  { %s110_s1 = scalar_lea.vmem %s88_s26, 256  ;;  %p115_p1 = scmp.lt.s32.totalorder %s88_s26, %s88_s26 }
   0x6   :  { %p111_p0 = scmp.ne.s32.totalorder %s88_s26, %s110_s1  ;;  %p116_p2 = scmp.lt.s32.totalorder %s110_s1, %s110_s1 }
   0x7   :  { %25 = vadd.xlane.f32.xlu0 %v24_v3 }
   0x8   :  { %p117_p3 = por %p116_p2, %p115_p1 }
   0xa   :  { %p118_p4 = pnand %p117_p3, %p111_p0 }
  0x1d   :  { %70 = vperm.xlu0 %104, %v66_v4  }
  0x90   :  { %v23_v6 = vpop.xlane.xlu0 %22 }
  0x91   :  { %v28_v7 = vmul.f32 0.03125, %v23_v6 }
  0x93   :  { %v30_v8 = vsub.f32 %v18_v0, %v28_v7 }
  0x94   :  { %v26_v9 = vpop.xlane.xlu0 %25 }
  0x95   :  { %v29_v10 = vmul.f32 0.03125, %v26_v9  ;;  %v32_v11 = vmul.f32 %v30_v8, %v30_v8 }
  0x97   :  { %v31_v12 = vsub.f32 %v19_v1, %v29_v10  ;;  %v34_v13 = vsel %vm20_vm0, %v32_v11, 0.0 }
  0x98   :  { %35 = vadd.xlane.f32.xlu1 %v34_v13 }
  0x99   :  { %v33_v14 = vmul.f32 %v31_v12, %v31_v12 }
  0x9b   :  { %v37_v15 = vsel %vm20_vm0, %v33_v14, 0.0 }
  0x9c   :  { %38 = vadd.xlane.f32.xlu1 %v37_v15  ;;  %v71_v29 = vpop.permute.xlu0 %70 }
  0xad   :  { %75 = vperm.xlu1 %105, %v67_v16  }
 0x125   :  { %v36_v17 = vpop.xlane.xlu1 %35 }
 0x126   :  { %v40_v18 = vmul.f32 0.03125, %v36_v17 }
 0x128   :  { %v42_v19 = vadd.f32 1e-05, %v40_v18 }
 0x129   :  { %v39_v20 = vpop.xlane.xlu1 %38 }
 0x12a   :  { %106 = vrsqrt.f32 %v42_v19  ;;  %v41_v21 = vmul.f32 0.03125, %v39_v20 }
 0x12c   :  { %v43_v22 = vadd.f32 1e-05, %v41_v21 }
 0x12d   :  { %v76_v34 = vpop.permute.xlu1 %75 }
 0x12e   :  { %108 = vrsqrt.f32 %v43_v22 }
 0x134   :  { %v107_v23 = vpop.eup %106 }
 0x135   :  { %v46_v25 = vmul.f32 %v107_v23, %v30_v8 }
 0x137   :  { %v55_v27 = vmul.f32 %v98_v24, %v46_v25 }
 0x138   :  { %v109_v28 = vpop.eup %108 }
 0x139   :  { %v64_v30 = vadd.f32 %v99_v26, %v55_v27  ;;  %v47_v31 = vmul.f32 %v109_v28, %v31_v12 }
 0x13b   :  { %v78_v32 = vmul.f32 %v71_v29, %v64_v30  ;;  %v56_v33 = vmul.f32 %v98_v24, %v47_v31 }
 0x13d   :  { %80 = vst.msk [vmem:[#allocation2] sm:$0xff] %vm20_vm0, %v78_v32  ;;  %v65_v35 = vadd.f32 %v99_v26, %v56_v33 }
 0x13f   :  { %v79_v36 = vmul.f32 %v76_v34, %v65_v35 }
 0x141   :  { %81 = vst.msk [vmem:[#allocation2 + $0x8] sm:$0xff] %vm20_vm0, %v79_v36 }
 0x142   :  { %121 = shalt.err (!%p118_p4)
}
 0x143   :  { %s122_s28 = scalar_lea.hbm %s203_s4, 256 }
 0x144   :  { %p123_p5 = scmp.ne.s32.totalorder %s203_s4, %s122_s28  ;;  %p126_p6 = scmp.lt.u32.totalorder %s122_s28, %s203_s4 }
 0x146   :  { %p128_p7 = pnand %p126_p6, %p123_p5 }
 0x148   :  { %131 = shalt.err (!%p128_p7)
}
 0x149   :  { %s136_s7 = smov 128   ;;  %s137_s8 = smov 8  }
 0x14a   :  { %93 = dma.vmem_to_hbm [thread:$0]  %s88_s26, 256, %s203_s4, [#allocation3], %s136_s7, %s136_s7, %s137_s8  }
 0x14b   :  { %132 = dma.done.wait [#allocation3], 256  }
 0x14c   :  { %133 = vsyncadd [#allocation3], 4294967040 }
 0x14d   :  { %97 = vsyncpa [#allocation3], 1 }

// kernel: node_decoder_layer.26
= control target key start
LH: loop header
LB: loop body
LE: loop exit
PB: predicated region body
PF: predicated region fallthrough
CT: control target
= control target key end

     0   :  { %vm33_vm0 = vcmask 261120   ;;  %vm132_vm1 = vcmask 523264   ;;  %s384_s1 = inlined_call_operand.vmem [shape: f32[32,64], index: 1, kind: input, shape index: {}]   ;;  %s385_s0 = inlined_call_operand.vmem [shape: f32[16,32], index: 0, kind: input, shape index: {}]   ;;  %s386_s3 = inlined_call_operand.vmem [shape: f32[64,32], index: 3, kind: input, shape index: {}]   ;;  %s387_s2 = inlined_call_operand.vmem [shape: f32[1,64], index: 2, kind: input, shape index: {}]   ;;  %s388_s4 = inlined_call_operand.vmem [shape: f32[1,32], index: 4, kind: input, shape index: {}]   ;;  %s389_s5 = inlined_call_operand.vmem [shape: f32[16,32], index: 5, kind: output, shape index: {}]  }
   0x1   :  { %v22_v0 = vld [vmem:[%s384_s1] sm:$0xff]  ;;  %v23_v1 = vld [vmem:[%s384_s1 + $0x8] sm:$0xff]  ;;  %v24_v2 = vld [vmem:[%s384_s1 + $0x10] sm:$0xff] }
   0x2   :  { %v272_v3 = vpack.c.bf16 %v23_v1, %v22_v0  ;;  %v25_v4 = vld [vmem:[%s384_s1 + $0x18] sm:$0xff]  ;;  %v20_v5 = vld [vmem:[%s385_s0] sm:$0xff]  ;;  %v118_v8 = vld [vmem:[%s386_s3 + $0x8] sm:$0xff] }
   0x3   :  { %v276_v6 = vpack.c.bf16 %v25_v4, %v24_v2  ;;  %250 = vmatprep.mubr.msk.f32.mxu0 %vm33_vm0, %v20_v5  ;;  %v117_v7 = vld [vmem:[%s386_s3] sm:$0xff]  ;;  %v119_v9 = vld [vmem:[%s386_s3 + $0x10] sm:$0xff]  ;;  %v120_v11 = vld [vmem:[%s386_s3 + $0x18] sm:$0xff] }
   0x4   :  { %273 = vmatprep.subr.bf16.mxu0 %v272_v3  ;;  %v280_v10 = vpack.c.bf16 %v118_v8, %v117_v7  ;;  %v284_v12 = vpack.c.bf16 %v120_v11, %v119_v9  ;;  %v121_v13 = vld [vmem:[%s386_s3 + $0x20] sm:$0xff]  ;;  %v122_v14 = vld [vmem:[%s386_s3 + $0x28] sm:$0xff]  ;;  %v123_v17 = vld [vmem:[%s386_s3 + $0x30] sm:$0xff] }
   0x5   :  { %275 = vmatpush3.bf16.msra.mxu0 %v272_v3  ;;  %v288_v15 = vpack.c.bf16 %v122_v14, %v121_v13  ;;  %v21_v16 = vld [vmem:[%s385_s0 + $0x8] sm:$0xff]  ;;  %v124_v18 = vld [vmem:[%s386_s3 + $0x38] sm:$0xff]  ;;  %v220_v20 = vld [vmem:[%s387_s2] ss:$0 sm:$0xff] }
   0x6   :  { %277 = vmatprep.subr.bf16.mxu0 %v276_v6  ;;  %281 = vmatprep.subr.bf16.mxu1 %v280_v10  ;;  %v292_v19 = vpack.c.bf16 %v124_v18, %v123_v17  ;;  %v223_v27 = vld [vmem:[%s388_s4] ss:$0 sm:$0xff] }
   0x7   :  { %283 = vmatpush3.bf16.msra.mxu1 %v280_v10 }
   0x8   :  { %285 = vmatprep.subr.bf16.mxu1 %v284_v12 }
   0x9   :  { %279 = vmatpush3.bf16.msra.mxu0 %v276_v6 }
   0xb   :  { %287 = vmatpush3.bf16.msra.mxu1 %v284_v12 }
   0xc   :  { %251 = vmatmul.mubr.msk.f32.vlgmr.msra.gmra.mrb[0].mxu0 %vm33_vm0, %v21_v16  ;;  %289 = vmatprep.subr.bf16.mxu1 %v288_v15 }
   0xf   :  { %291 = vmatpush3.bf16.msra.mxu1 %v288_v15 }
  0x10   :  { %293 = vmatprep.subr.bf16.mxu1 %v292_v19 }
  0x13   :  { %295 = vmatpush3.bf16.msra.mxu1 %v292_v19 }
  0xdf   :  { %v252_v21 = vpop.f32.mrb[0].mxu0 }
  0xe0   :  { %v112_v22 = vadd.f32 %v252_v21, %v220_v20  ;;  %v106_v23 = vpop.f32.mrb[1].mxu0 }
  0xe1   :  { %v107_v24 = vadd.f32 %v220_v20, %v106_v23 }
  0xe2   :  { %v116_v26 = vmax.f32 %v112_v22, 0.0 }
  0xe3   :  { %v115_v25 = vmax.f32 %v107_v24, 0.0 }
  0xe5   :  { %269 = vmatprep.mubr.msk.f32.mxu1 %vm132_vm1, %v115_v25 }
  0xe6   :  { %270 = vmatmul.mubr.msk.f32.vlgmr.msra.gmra.mrb[0].mxu1 %vm132_vm1, %v116_v26 }
 0x1b9   :  { %v271_v28 = vpop.f32.mrb[0].mxu1 }
 0x1ba   :  { %v211_v29 = vadd.f32 %v271_v28, %v223_v27  ;;  %v205_v30 = vpop.f32.mrb[1].mxu1 }
 0x1bb   :  { %v206_v31 = vadd.f32 %v223_v27, %v205_v30 }
 0x1bc   :  { %215 = vst.msk [vmem:[%s389_s5 + $0x8] sm:$0xff] %vm33_vm0, %v211_v29 }
 0x1bd   :  { %214 = vst.msk [vmem:[%s389_s5] sm:$0xff] %vm33_vm0, %v206_v31 }

// kernel: node_decoder_layer.23
= control target key start
LH: loop header
LB: loop body
LE: loop exit
PB: predicated region body
PF: predicated region fallthrough
CT: control target
= control target key end

     0   :  { %s620_s15 = smov 0   ;;  %s662_s0 = inlined_call_operand.vmem [shape: f32[8,8,8], index: 0, kind: input, shape index: {}]   ;;  %s663_s1 = inlined_call_operand.vmem [shape: f32[8,12,8], index: 1, kind: input, shape index: {}]   ;;  %s664_s2 = inlined_call_operand.vmem [shape: f32[8,12,8], index: 2, kind: input, shape index: {}]   ;;  %s665_s3 = inlined_call_operand.vmem [shape: f32[8,8,12], index: 3, kind: input, shape index: {}]   ;;  %s666_s4 = inlined_call_operand.vmem [shape: f32[8,8,8], index: 4, kind: output, shape index: {}]  }
   0x1 LB: > { %s518_s16 = sadd.s32 4294967295, %s589_s15   ;;  %p522_p0 = scmp.ge.s32.totalorder %s589_s15, 1  ;;  %s589_s15 = sphi %s620_s15, %s14_s15  }
   0x2   : > { %p190_p1 = scmp.lt.s32.totalorder %s589_s15, 9 }
   0x4   : > { %p191_p2 = pnand %p522_p0, %p190_p1 }
   0x5   : > { %p228_p3 = scmp.lt.s32.totalorder (!%p191_p2), %s518_s16, 7  ;;  %v591_v0 = vmov (!%p191_p2), 0.0|0.0   ;;  %vm592_vm0 = vmmov (!%p191_p2), 0   ;;  %v593_v1 = vmov (!%p191_p2), 0.0   ;;  %vm253_vm1 = vcmask (!%p191_p2), 64512  }
   0x6   : > { %194 = sbr.rel (%p191_p2) target bundleno = 768 (0x300), region = 36  ;;  %559 = vmatprep.subr.bf16.mxu0 (!%p191_p2), %v591_v0  ;;  %549 = vmatprep.mubr.msk.f32.mxu0 (!%p191_p2), %vm592_vm0, %v593_v1  ;;  %vm561_vm2 = vmpackc.low (!%p191_p2), %vm253_vm1, %vm253_vm1  ;;  %vm337_vm4 = vcmask (!%p191_p2), 97280   ;;  %vm354_vm5 = vcmask (!%p191_p2), 1043456   ;;  %vm594_vm6 = vmmov (!%p191_p2), 1  }
   0x7   : > { %563 = vmatprep.subr.bf16.mxu1 (!%p191_p2), %v591_v0  ;;  %556 = vmatprep.mubr.msk.f32.mxu1 (!%p191_p2), %vm592_vm0, %v593_v1  ;;  %vm565_vm7 = vmpackc.low (!%p191_p2), %vm354_vm5, %vm594_vm6 }
   0xd   : > { %s668_s16 = smov (!%p228_p3, %s518_s16), 7 }
   0xe   : > { %s537_s17 = sshll.u32 %s668_s16, 4  ;;  %s637_s21 = sshll.u32 %s668_s16, 3 }
   0xf   : > { %s236_s20 = scalar_lea.vmem %s663_s1, %s537_s17  ;;  %s231_s24 = scalar_lea.vmem %s662_s0, %s637_s21 }
  0x10   : > { %v251_v2 = vld [vmem:[%s236_s20] sm:$0xff]  ;;  %v252_v3 = vld [vmem:[%s236_s20 + $0x8] sm:$0xf]  ;;  %s245_s27 = scalar_lea.vmem %s665_s3, %s637_s21  ;;  %s241_s30 = scalar_lea.vmem %s664_s2, %s537_s17 }
  0x11   : > { %v560_v4 = vpack.c.bf16 %v252_v3, %v251_v2  ;;  %v250_v5 = vld [vmem:[%s231_s24] sm:$0xff]  ;;  %v350_v18 = vld [vmem:[%s241_s30 + $0x8] sm:$0xf]  ;;  %s249_s7 = scalar_lea.vmem %s666_s4, %s637_s21 }
  0x12   : > { %v334_v6 = vld [vmem:[%s245_s27] sm:$0xff] }
  0x13   : > { %562 = vmatpush3.bf16.xpose.msk.msra.mxu0 %vm561_vm2, %v560_v4  ;;  %vm335_vm3 = vcmp.gt.f32.partialorder %v334_v6, 0.0  ;;  %v349_v17 = vld [vmem:[%s241_s30] sm:$0xff] }
  0x14   : > { %v564_v19 = vpack.c.bf16 %v350_v18, %v349_v17 }
  0x16   : > { %566 = vmatpush3.bf16.msk.msra.mxu1 %vm565_vm7, %v564_v19 }
  0x1a   : > { %550 = vmatmul.mubr.msk.f32.vlgmr.msra.gmra.mrb[0].mxu0 %vm253_vm1, %v250_v5 }
  0xed   : > { %v329_v7 = vpop.f32.mrb[0].mxu0 }
  0xee   : > { %v333_v8 = vmul.f32 0.35355338, %v329_v7  ;;  %v551_v9 = vpop.f32.mrb[1].mxu0 }
  0xf0   : > { %v336_v10 = vsel %vm335_vm3, -1e+30, %v333_v8 }
  0xf1   : > { %v338_v11 = vsel %vm337_vm4, %v336_v10, -inf }
  0xf2   : > { %339 = vmax.xlane.f32.xlu0 %v338_v11 }
 0x17f   : > { %v340_v12 = vpop.xlane.xlu0 %339 }
 0x180   : > { %v341_v13 = vsub.f32 %v336_v10, %v340_v12 }
 0x182   : > { %v342_v14 = vmul.f32 1.442695, %v341_v13 }
 0x184   : > { %579 = vpow2.f32 %v342_v14 }
 0x18e   : > { %v580_v15 = vpop.eup %579 }
 0x18f   : > { %v344_v16 = vsel %vm337_vm4, %v580_v15, 0.0 }
 0x190   : > { %345 = vadd.xlane.f32.xlu0 %v344_v16 }
 0x21d   : > { %v346_v20 = vpop.xlane.xlu0 %345 }
 0x21e   : > { %581 = vrcp.f32 %v346_v20 }
 0x228   : > { %v582_v21 = vpop.eup %581 }
 0x229   : > { %v348_v22 = vmul.f32 %v582_v21, %v580_v15 }
 0x22b   : > { %557 = vmatmul.mubr.msk.f32.vlgmr.msra.gmra.mrb[0].mxu1 %vm337_vm4, %v348_v22 }
 0x2fe   : > { %v424_v23 = vpop.f32.mrb[0].mxu1 }
 0x2ff   : > { %428 = vst.msk [vmem:[%s249_s7] sm:$0xff] %vm253_vm1, %v424_v23  ;;  %v558_v24 = vpop.f32.mrb[1].mxu1 }
 0x300 PF: > { %s14_s15 = sadd.s32 1, %s589_s15  }
 0x301   : > { %p11_p4 = scmp.ge.s32.totalorder %s14_s15, 10  }
 0x303   :  { %13 = sbr.rel (!%p11_p4) target bundleno = 1 (0x1), region = 75 }

</bundles_post_ra>
